<compile_context>
chip_gen: v6e
topology: v6e:2x2x1
jax: 0.10.0
libtpu: 0.0.40
codegen_flags: <defaults>
</compile_context>

<pallas_src>
import functools

import jax
import jax.numpy as jnp
from jax import lax
from jax.experimental import pallas as pl
from jax.experimental.pallas import tpu as pltpu

_LANES = 128
_SUBLANES = 8
_MAX_TILE_ROWS = 8192


# ---------------------------------------------------------------------------
# Sizing helpers
# ---------------------------------------------------------------------------
def _tpu_vmem_bytes() -> int:
    try:
        return int(pltpu.get_tpu_info().vmem_capacity_bytes)
    except Exception:
        return 64 * 1024 * 1024          # conservative fallback (v7x-sized)


def _vmem_limit_bytes() -> int:
    # ~64 MiB scoped limit on 128-MiB chips (v5e/v6e), ~48 MiB on v7x (64 MiB).
    return int(min(_tpu_vmem_bytes() * 3 // 4, 64 * 1024 * 1024))


def _pick_row_tile(work_bytes_per_row: int, budget_bytes: int) -> int:
    """Row tile sized by the in-kernel working set, capped at _MAX_TILE_ROWS."""
    tn = budget_bytes // max(1, work_bytes_per_row)
    return int(max(_SUBLANES, min(tn, _MAX_TILE_ROWS)))


def _legalize_rows(tn: int, total: int) -> int:
    """Clamp so the BlockSpec is legal: row tile is a multiple of 8 or == total."""
    tn = max(1, min(int(tn), int(total)))
    if tn == total:
        return tn
    tn = (tn // _SUBLANES) * _SUBLANES
    if tn == 0:
        tn = _SUBLANES
    return min(tn, total)


# ---------------------------------------------------------------------------
# In-kernel accumulation helper
# ---------------------------------------------------------------------------
def _accum_rows(acc_ref, vals):
    """Accumulate (TN, W) values into an (8, W) f32 scratch with VPU adds only.

    For TN % 8 == 0 the reshape groups rows into native (8, W) slabs and the
    leading-axis sum lowers to vreg adds (no XLU, no scalar carried dep).
    The fallback (TN not a multiple of 8 => single tiny grid step) folds the
    rows into sublane 0 with one small sublane reduce.
    """
    tn, w = vals.shape
    if tn % _SUBLANES == 0:
        acc_ref[...] += jnp.sum(vals.reshape(tn // _SUBLANES, _SUBLANES, w), axis=0)
    else:
        acc_ref[0:1, :] = acc_ref[0:1, :] + jnp.sum(vals, axis=0, keepdims=True)


# ---------------------------------------------------------------------------
# Kernels
# ---------------------------------------------------------------------------
def _multiclass_ce_kernel(logits_ref, labels_ref, loss_ref, acc_ref, *, n_rows, tile_rows):
    """Accumulates sum_i( logsumexp(x_i) - x_i[label_i] ); divides by N in finalize."""
    i = pl.program_id(0)
    last = pl.num_programs(0) - 1

    @pl.when(i == 0)
    def _():
        acc_ref[...] = jnp.zeros_like(acc_ref)

    logits = logits_ref[...].astype(jnp.float32)                  # (TN, C)
    labels = labels_ref[...]                                      # (TN, 1) int32
    tn, c = logits.shape

    # (TN, 1) row-validity mask (partial last block on the unpadded array).
    row_ids = i * tile_rows + lax.broadcasted_iota(jnp.int32, (tn, 1), 0)
    row_valid = row_ids < n_rows                                  # (TN, 1) bool

    # Keep OOB garbage out of exp; stable log-softmax pieces.
    x = jnp.where(row_valid, logits, 0.0)                         # (TN, C)
    m = jnp.max(x, axis=-1, keepdims=True)                        # (TN, 1)
    xs = x - m
    lse = jnp.log(jnp.sum(jnp.exp(xs), axis=-1, keepdims=True))   # (TN, 1)

    cls_idx = lax.broadcasted_iota(jnp.int32, (tn, c), 1)
    tgt = jnp.sum(jnp.where(cls_idx == labels, xs, 0.0), axis=-1, keepdims=True)

    per_row = jnp.where(row_valid, lse - tgt, 0.0)                # (TN, 1)
    _accum_rows(acc_ref, per_row)

    @pl.when(i == last)
    def _():
        loss_ref[...] = (jnp.sum(acc_ref[...]) * (1.0 / n_rows)).reshape(1, 1)


def _binary_bce_kernel(x_ref, y_ref, loss_ref, acc_ref, *, n_valid, tile_rows):
    """Accumulates sum( max(x,0) - x*y + log1p(exp(-|x|)) ); divides by N in finalize."""
    i = pl.program_id(0)
    last = pl.num_programs(0) - 1

    @pl.when(i == 0)
    def _():
        acc_ref[...] = jnp.zeros_like(acc_ref)

    x = x_ref[...].astype(jnp.float32)                            # (TR, 128)
    y = y_ref[...].astype(jnp.float32)                            # labels.float()
    tr, lanes = x.shape

    def bce(xv, yv):
        return jnp.maximum(xv, 0.0) - xv * yv + jnp.log1p(jnp.exp(-jnp.abs(xv)))

    @pl.when(i < last)
    def _():
        # Interior tiles are fully valid: unmasked fast path (load -> VPU/EUP -> add).
        _accum_rows(acc_ref, bce(x, y))

    @pl.when(i == last)
    def _():
        # Last tile: mask padded tail elements and OOB block rows.
        row = lax.broadcasted_iota(jnp.int32, (tr, lanes), 0)
        lane = lax.broadcasted_iota(jnp.int32, (tr, lanes), 1)
        flat = (i * tile_rows + row) * lanes + lane
        valid = flat < n_valid
        xm = jnp.where(valid, x, 0.0)                             # keep garbage out of exp
        ym = jnp.where(valid, y, 0.0)
        per = jnp.where(valid, bce(xm, ym), 0.0)
        _accum_rows(acc_ref, per)
        loss_ref[...] = (jnp.sum(acc_ref[...]) * (1.0 / n_valid)).reshape(1, 1)


# ---------------------------------------------------------------------------
# Wrapper (mirrors ClassificationLoss.forward)
# ---------------------------------------------------------------------------
def classification_loss(preds, labels, task: str = "multiclass", block_rows=None):
    # Matches `preds.squeeze()` (removes ALL size-1 dims); like the torch original
    # this assumes a multiclass batch dim > 1.
    preds = jnp.squeeze(preds)

    vmem_limit = _vmem_limit_bytes()
    budget = vmem_limit // 2
    cparams = pltpu.CompilerParams(
        dimension_semantics=("arbitrary",),
        vmem_limit_bytes=vmem_limit,
    )

    if task == "multiclass":
        n, c = preds.shape
        logits = preds                                            # native dtype; cast in-kernel
        labels2d = labels.reshape(n).astype(jnp.int32).reshape(n, 1)

        itemsize = jnp.dtype(logits.dtype).itemsize
        # per-row working set: logits double-buffered + ~5 f32/int32 full-tile temps,
        # plus the (tiny) labels column.
        work_row = c * (2 * itemsize + 5 * 4) + (2 * 4 + 4)
        tn = block_rows if block_rows is not None else _pick_row_tile(work_row, budget)
        tn = _legalize_rows(tn, n)
        grid = (pl.cdiv(n, tn),)

        kernel = functools.partial(_multiclass_ce_kernel, n_rows=n, tile_rows=tn)
        out = pl.pallas_call(
            kernel,
            out_shape=jax.ShapeDtypeStruct((1, 1), jnp.float32),
            grid=grid,
            in_specs=[
                pl.BlockSpec((tn, c), lambda i: (i, 0)),
                pl.BlockSpec((tn, 1), lambda i: (i, 0)),
            ],
            out_specs=pl.BlockSpec((1, 1), lambda i: (0, 0)),
            scratch_shapes=[pltpu.VMEM((_SUBLANES, 1), jnp.float32)],
            compiler_params=cparams,
        )(logits, labels2d)
        return out[0, 0]

    elif task == "binary":
        x = preds.reshape(-1)                                     # native dtype
        y = labels.reshape(-1)                                    # .float() happens in-kernel
        n = int(x.shape[0])

        rem = n % _LANES
        if rem:
            # Only the <=127-element tail is padded; the aligned case is a free reshape.
            x = jnp.pad(x, (0, _LANES - rem))
            y = jnp.pad(y, (0, _LANES - rem))
        r = x.shape[0] // _LANES
        x2 = x.reshape(r, _LANES)
        y2 = y.reshape(r, _LANES)

        work_row = _LANES * (
            2 * max(4, jnp.dtype(x2.dtype).itemsize)
            + 2 * max(4, jnp.dtype(y2.dtype).itemsize)
            + 3 * 4
        )
        tr = block_rows if block_rows is not None else _pick_row_tile(work_row, budget)
        tr = _legalize_rows(tr, r)
        grid = (pl.cdiv(r, tr),)

        kernel = functools.partial(_binary_bce_kernel, n_valid=n, tile_rows=tr)
        out = pl.pallas_call(
            kernel,
            out_shape=jax.ShapeDtypeStruct((1, 1), jnp.float32),
            grid=grid,
            in_specs=[
                pl.BlockSpec((tr, _LANES), lambda i: (i, 0)),
                pl.BlockSpec((tr, _LANES), lambda i: (i, 0)),
            ],
            out_specs=pl.BlockSpec((1, 1), lambda i: (0, 0)),
            scratch_shapes=[pltpu.VMEM((_SUBLANES, _LANES), jnp.float32)],
            compiler_params=cparams,
        )(x2, y2)
        return out[0, 0]

    else:
        raise ValueError(
            "Only `binary` or `multiclass` classification task modes are supported."
        )


# ---------------------------------------------------------------------------
# Pure-JAX references for validation
# ---------------------------------------------------------------------------
def _ref_multiclass(preds, labels):
    preds = jnp.squeeze(preds).astype(jnp.float32)
    logp = jax.nn.log_softmax(preds, axis=-1)
    return -jnp.mean(
        jnp.take_along_axis(logp, labels.reshape(-1, 1).astype(jnp.int32), axis=-1)
    )


def _ref_binary(preds, labels):
    x = jnp.squeeze(preds).astype(jnp.float32).reshape(-1)
    y = labels.astype(jnp.float32).reshape(-1)
    return jnp.mean(jnp.maximum(x, 0.0) - x * y + jnp.log1p(jnp.exp(-jnp.abs(x))))


if __name__ == "__main__":
    key = jax.random.PRNGKey(0)
    ks = jax.random.split(key, 12)

    # ----- multiclass: batch=8, classes=32, trailing singleton exercises squeeze
    N, C = 8, 32
    preds_mc = jax.random.normal(ks[0], (N, C, 1), dtype=jnp.float32)
    labels_mc = jax.random.randint(ks[1], (N,), 0, C, dtype=jnp.int32)
    loss_mc = classification_loss(preds_mc, labels_mc, task="multiclass")
    jax.block_until_ready(loss_mc)
    ref_mc = _ref_multiclass(preds_mc, labels_mc)
    assert jnp.allclose(loss_mc, ref_mc, atol=1e-5, rtol=1e-5), (loss_mc, ref_mc)

    # ----- multiclass: batch not a multiple of 8 (unpadded partial block + row mask)
    N2, C2 = 6, 32
    preds_mc2 = jax.random.normal(ks[2], (N2, C2), dtype=jnp.float32)
    labels_mc2 = jax.random.randint(ks[3], (N2,), 0, C2, dtype=jnp.int32)
    loss_mc2 = classification_loss(preds_mc2, labels_mc2, task="multiclass")
    jax.block_until_ready(loss_mc2)
    ref_mc2 = _ref_multiclass(preds_mc2, labels_mc2)
    assert jnp.allclose(loss_mc2, ref_mc2, atol=1e-5, rtol=1e-5), (loss_mc2, ref_mc2)

    # ----- multiclass: multi-step grid with a partial last tile (block_rows override)
    N3, C3 = 21, 32
    preds_mc3 = jax.random.normal(ks[4], (N3, C3), dtype=jnp.float32)
    labels_mc3 = jax.random.randint(ks[5], (N3,), 0, C3, dtype=jnp.int32)
    loss_mc3 = classification_loss(preds_mc3, labels_mc3, task="multiclass", block_rows=8)
    jax.block_until_ready(loss_mc3)
    ref_mc3 = _ref_multiclass(preds_mc3, labels_mc3)
    assert jnp.allclose(loss_mc3, ref_mc3, atol=1e-5, rtol=1e-5), (loss_mc3, ref_mc3)

    # ----- binary: batch=8 logits with trailing singleton, integer 0/1 labels
    preds_bin = jax.random.normal(ks[6], (N, 1), dtype=jnp.float32)
    labels_bin = jax.random.randint(ks[7], (N,), 0, 2, dtype=jnp.int32)
    loss_bin = classification_loss(preds_bin, labels_bin, task="binary")
    jax.block_until_ready(loss_bin)
    ref_bin = _ref_binary(preds_bin, labels_bin)
    assert jnp.allclose(loss_bin, ref_bin, atol=1e-5, rtol=1e-5), (loss_bin, ref_bin)

    # ----- binary: bf16 logits, batch=10 (native-dtype path + tail masking)
    N4 = 10
    preds_b16 = jax.random.normal(ks[8], (N4,), dtype=jnp.bfloat16)
    labels_b16 = jax.random.randint(ks[9], (N4,), 0, 2, dtype=jnp.int32)
    loss_b16 = classification_loss(preds_b16, labels_b16, task="binary")
    jax.block_until_ready(loss_b16)
    ref_b16 = _ref_binary(preds_b16, labels_b16)
    assert jnp.allclose(loss_b16, ref_b16, atol=1e-4, rtol=1e-4), (loss_b16, ref_b16)

    # ----- binary: multi-step grid (interior fast path + masked last tile)
    N5 = 2000
    preds_b2 = jax.random.normal(ks[10], (N5,), dtype=jnp.float32)
    labels_b2 = jax.random.randint(ks[11], (N5,), 0, 2, dtype=jnp.int32)
    loss_b2 = classification_loss(preds_b2, labels_b2, task="binary", block_rows=8)
    jax.block_until_ready(loss_b2)
    ref_b2 = _ref_binary(preds_b2, labels_b2)
    assert jnp.allclose(loss_b2, ref_b2, atol=1e-5, rtol=1e-5), (loss_b2, ref_b2)

    print("KERNEL_OK")
</pallas_src>

<mosaic_0001>
module attributes {stable_mosaic.version = 11 : i64} {
  func.func @_multiclass_ce_kernel(%arg0: i32, %arg1: memref<8x32xf32, #tpu.memory_space<vmem>>, %arg2: memref<8x1xi32, #tpu.memory_space<vmem>>, %arg3: memref<1x1xf32, #tpu.memory_space<vmem>>, %arg4: memref<8x1xf32, #tpu.memory_space<vmem>>) attributes {dimension_semantics = [#tpu.dimension_semantics<arbitrary>], iteration_bounds = array<i64: 1>, scalar_prefetch = 0 : i64, scratch_operands = 1 : i64, tpu.core_type = #tpu.core_type<tc>, window_params = [{transform_indices = @transform_0, window_bounds = array<i64: 8, 32>}, {transform_indices = @transform_1, window_bounds = array<i64: 8, 1>}, {pipeline_mode = #tpu.pipeline_mode<synchronous>, transform_indices = @transform_2, window_bounds = array<i64: 1, 1>}]} {
    %c0_i32 = arith.constant 0 : i32
    %0 = arith.cmpi eq, %arg0, %c0_i32 : i32
    %1 = arith.extui %0 : i1 to i32
    %c0_i32_0 = arith.constant 0 : i32
    %2 = arith.cmpi ne, %1, %c0_i32_0 : i32
    scf.if %2 {
      %cst_17 = arith.constant 0.000000e+00 : f32
      %41 = vector.broadcast %cst_17 : f32 to vector<8x1xf32>
      %c0_18 = arith.constant 0 : index
      %c0_19 = arith.constant 0 : index
      %42 = vector.load %arg4[%c0_18, %c0_19] : memref<8x1xf32, #tpu.memory_space<vmem>>, vector<8x1xf32>
      tpu.vector_store %arg4[%c0_18, %c0_19], %41 {strides = array<i32>} : memref<8x1xf32, #tpu.memory_space<vmem>>, vector<8x1xf32>,
    } else {
    }
    %c0 = arith.constant 0 : index
    %c0_1 = arith.constant 0 : index
    %3 = vector.load %arg1[%c0, %c0_1] : memref<8x32xf32, #tpu.memory_space<vmem>>, vector<8x32xf32>
    %c0_2 = arith.constant 0 : index
    %c0_3 = arith.constant 0 : index
    %4 = vector.load %arg2[%c0_2, %c0_3] : memref<8x1xi32, #tpu.memory_space<vmem>>, vector<8x1xi32>
    %c8_i32 = arith.constant 8 : i32
    %5 = arith.muli %arg0, %c8_i32 : i32
    %6 = tpu.iota {dimensions = array<i32: 0>} : vector<8x1xi32>
    %7 = vector.broadcast %5 : i32 to vector<8x1xi32>
    %8 = arith.addi %7, %6 : vector<8x1xi32>
    %c8_i32_4 = arith.constant 8 : i32
    %9 = vector.broadcast %c8_i32_4 : i32 to vector<8x1xi32>
    %10 = arith.cmpi slt, %8, %9 : vector<8x1xi32>
    %cst = arith.constant 0.000000e+00 : f32
    %11 = vector.shape_cast %10 : vector<8x1xi1> to vector<8x1xi1>
    %12 = vector.broadcast %11 : vector<8x1xi1> to vector<8x32xi1>
    %13 = vector.broadcast %cst : f32 to vector<8x32xf32>
    %14 = arith.select %12, %3, %13 : vector<8x32xi1>, vector<8x32xf32>
    %cst_5 = arith.constant dense<0xFF800000> : vector<8xf32>
    %15 = vector.multi_reduction <maximumf>, %14, %cst_5 [1] : vector<8x32xf32> to vector<8xf32>
    %16 = vector.shape_cast %15 : vector<8xf32> to vector<8x1xf32>
    %17 = vector.broadcast %16 : vector<8x1xf32> to vector<8x32xf32>
    %18 = arith.subf %14, %17 : vector<8x32xf32>
    %19 = math.exp %18 : vector<8x32xf32>
    %cst_6 = arith.constant dense<0.000000e+00> : vector<8xf32>
    %20 = vector.multi_reduction <add>, %19, %cst_6 [1] : vector<8x32xf32> to vector<8xf32>
    %21 = vector.shape_cast %20 : vector<8xf32> to vector<8x1xf32>
    %22 = math.log %21 : vector<8x1xf32>
    %23 = tpu.iota {dimensions = array<i32: 1>} : vector<8x32xi32>
    %24 = vector.broadcast %4 : vector<8x1xi32> to vector<8x32xi32>
    %25 = arith.cmpi eq, %23, %24 : vector<8x32xi32>
    %cst_7 = arith.constant 0.000000e+00 : f32
    %26 = vector.broadcast %cst_7 : f32 to vector<8x32xf32>
    %27 = arith.select %25, %18, %26 : vector<8x32xi1>, vector<8x32xf32>
    %cst_8 = arith.constant dense<0.000000e+00> : vector<8xf32>
    %28 = vector.multi_reduction <add>, %27, %cst_8 [1] : vector<8x32xf32> to vector<8xf32>
    %29 = vector.shape_cast %28 : vector<8xf32> to vector<8x1xf32>
    %30 = arith.subf %22, %29 : vector<8x1xf32>
    %cst_9 = arith.constant 0.000000e+00 : f32
    %31 = vector.broadcast %cst_9 : f32 to vector<8x1xf32>
    %32 = arith.select %10, %30, %31 : vector<8x1xi1>, vector<8x1xf32>
    %c0_10 = arith.constant 0 : index
    %c0_11 = arith.constant 0 : index
    %33 = vector.load %arg4[%c0_10, %c0_11] : memref<8x1xf32, #tpu.memory_space<vmem>>, vector<8x1xf32>
    %34 = vector.shape_cast %32 : vector<8x1xf32> to vector<1x8x1xf32>
    %cst_12 = arith.constant dense<0.000000e+00> : vector<8x1xf32>
    %35 = vector.multi_reduction <add>, %34, %cst_12 [0] : vector<1x8x1xf32> to vector<8x1xf32>
    %36 = arith.addf %33, %35 : vector<8x1xf32>
    %c0_13 = arith.constant 0 : index
    %c0_14 = arith.constant 0 : index
    %37 = vector.load %arg4[%c0_13, %c0_14] : memref<8x1xf32, #tpu.memory_space<vmem>>, vector<8x1xf32>
    tpu.vector_store %arg4[%c0_13, %c0_14], %36 {strides = array<i32>} : memref<8x1xf32, #tpu.memory_space<vmem>>, vector<8x1xf32>,
    %c0_i32_15 = arith.constant 0 : i32
    %38 = arith.cmpi eq, %arg0, %c0_i32_15 : i32
    %39 = arith.extui %38 : i1 to i32
    %c0_i32_16 = arith.constant 0 : i32
    %40 = arith.cmpi ne, %39, %c0_i32_16 : i32
    scf.if %40 {
      %c0_17 = arith.constant 0 : index
      %c0_18 = arith.constant 0 : index
      %41 = vector.load %arg4[%c0_17, %c0_18] : memref<8x1xf32, #tpu.memory_space<vmem>>, vector<8x1xf32>
      %42 = vector.shape_cast %41 : vector<8x1xf32> to vector<1x8x1xf32>
      %cst_19 = arith.constant dense<0.000000e+00> : vector<1xf32>
      %43 = vector.multi_reduction <add>, %42, %cst_19 [1, 2] : vector<1x8x1xf32> to vector<1xf32>
      %44 = vector.shape_cast %43 : vector<1xf32> to vector<1x1x1xf32>
      %45 = vector.extract %44[0, 0, 0] : f32 from vector<1x1x1xf32>
      %cst_20 = arith.constant 1.250000e-01 : f32
      %46 = arith.mulf %45, %cst_20 : f32
      %47 = vector.broadcast %46 : f32 to vector<1x1xf32>
      %c0_21 = arith.constant 0 : index
      %c0_22 = arith.constant 0 : index
      %48 = vector.load %arg3[%c0_21, %c0_22] : memref<1x1xf32, #tpu.memory_space<vmem>>, vector<1x1xf32>
      tpu.vector_store %arg3[%c0_21, %c0_22], %47 {strides = array<i32>} : memref<1x1xf32, #tpu.memory_space<vmem>>, vector<1x1xf32>,
    } else {
    }
    return
  }
  func.func @transform_0(%arg0: i32) -> (i32, i32) {
    %c0_i32 = arith.constant 0 : i32
    %c0_i32_0 = arith.constant 0 : i32
    return %arg0, %c0_i32 : i32, i32
  }
  func.func @transform_1(%arg0: i32) -> (i32, i32) {
    %c0_i32 = arith.constant 0 : i32
    %c0_i32_0 = arith.constant 0 : i32
    return %arg0, %c0_i32 : i32, i32
  }
  func.func @transform_2(%arg0: i32) -> (i32, i32) {
    %c0_i32 = arith.constant 0 : i32
    %c0_i32_0 = arith.constant 0 : i32
    %c0_i32_1 = arith.constant 0 : i32
    return %c0_i32, %c0_i32_0 : i32, i32
  }
}

</mosaic_0001>

<bundles_post_ra>
// kernel: tpu_custom_call.1
= control target key start
LH: loop header
LB: loop body
LE: loop exit
PB: predicated region body
PF: predicated region fallthrough
CT: control target
= control target key end

     0   :  { %vm29_vm0 = vcmask 261120   ;;  %s152_s0 = inlined_call_operand.vmem [shape: f32[8,32], index: 0, kind: input, shape index: {}]   ;;  %s153_s1 = inlined_call_operand.vmem [shape: s32[8,1], index: 1, kind: input, shape index: {}]   ;;  %s154_s2 = inlined_call_operand.hbm [shape: f32[1,1], index: 2, kind: output, shape index: {}]  }
   0x1   :  { %v18_v0 = vld [vmem:[%s152_s0] sm:$0xff] }
   0x2   :  { %7 = vsyncpa [#allocation4], 0  ;;  %v30_v1 = vsel %vm29_vm0, %v18_v0, -inf  ;;  %v122_v2 = vmov 0   ;;  %v19_v3 = vld [vmem:[%s153_s1] sm:$0xff]  ;;  %v41_v7 = vlaneseq  ;;  %vm16_vm2 = vcmask 7168  }
   0x3   :  { %95 = vset.pattern.permute.xlu0 %v122_v2  ;;  %v123_v14 = vmov 0.0   ;;  %s124_s0 = smov [#allocation3]   ;;  %vm74_vm3 = vcmask 0  }
   0x4   :  { %31 = vmax.xlane.f32.xlu0 %v30_v1  ;;  %v42_v8 = vand.u32 127, %v41_v7  ;;  %17 = vst.msk [vmem:[#allocation2] sm:$0xff] %vm16_vm2, %v123_v14  ;;  %s82_s1 = sshll.u32 %s124_s0, 4  ;;  %s83_s1 = int_to_ptr.vmem [resolvable:$true] %s82_s1 }
   0x5   :  { %s100_s15 = scalar_lea.vmem %s83_s1, 16  ;;  %s104_s16 = scalar_lea.vmem %s83_s1, 32 }
   0x6   :  { %p101_p0 = scmp.ne.s32.totalorder %s83_s1, %s100_s15  ;;  %p105_p1 = scmp.lt.s32.totalorder %s83_s1, %s83_s1 }
   0x7   :  { %p106_p2 = scmp.lt.s32.totalorder %s104_s16, %s100_s15 }
   0x9   :  { %p107_p3 = por %p106_p2, %p105_p1 }
   0xb   :  { %v53_v19 = vld [vmem:[#allocation2] sm:$0xff]  ;;  %p108_p4 = pnand %p107_p3, %p101_p0 }
  0x1a   :  { %44 = vperm.xlu0 %95, %v19_v3  }
  0x8d   :  { %v32_v4 = vpop.xlane.xlu0 %31 }
  0x8e   :  { %v33_v5 = vsub.f32 %v18_v0, %v32_v4 }
  0x90   :  { %v34_v6 = vmul.f32 1.442695, %v33_v5 }
  0x92   :  { %96 = vpow2.f32 %v34_v6 }
  0x95   :  { %v45_v9 = vpop.permute.xlu0 %44 }
  0x96   :  { %vm46_vm1 = vcmp.eq.s32.totalorder %v42_v8, %v45_v9 }
  0x97   :  { %v47_v12 = vsel %vm46_vm1, %v33_v5, 0.0 }
  0x98   :  { %v48_v13 = vsel %vm29_vm0, %v47_v12, 0.0 }
  0x9f   :  { %v97_v10 = vpop.eup %96 }
  0xa0   :  { %v36_v11 = vsel %vm29_vm0, %v97_v10, 0.0 }
  0xa1   :  { %37 = vadd.xlane.f32.xlu1 %v36_v11 }
  0xa5   :  { %49 = vadd.xlane.f32.xlu1 %v48_v13 }
 0x12a   :  { %v38_v15 = vpop.xlane.xlu1 %37 }
 0x12b   :  { %98 = vlog2.f32 %v38_v15 }
 0x12e   :  { %v50_v18 = vpop.xlane.xlu1 %49 }
 0x138   :  { %v99_v16 = vpop.eup %98 }
 0x139   :  { %v40_v17 = vmul.f32 0.6931472, %v99_v16 }
 0x13b   :  { %v51_v20 = vsub.f32 %v40_v17, %v50_v18 }
 0x13d   :  { %v55_v21 = vadd.f32 %v53_v19, %v51_v20 }
 0x13f   :  { %57 = vst.msk [vmem:[#allocation2] sm:$0xff] %vm16_vm2, %v55_v21 }
 0x146   :  { %v61_v22 = vld [vmem:[#allocation2] sm:$0xff] }
 0x147   :  { %v62_v23 = vsel %vm16_vm2, %v61_v22, 0.0 }
 0x148   :  { %63 = vadd.xlane.f32.xlu1 %v62_v23 }
 0x1d1   :  { %v64_v24 = vpop.xlane.xlu1 %63 }
 0x1d2   :  { %v65_v25 = vrot.slane %v64_v24, 4 }
 0x1d4   :  { %v66_v26 = vadd.f32 %v65_v25, %v64_v24 }
 0x1d6   :  { %v67_v27 = vrot.slane %v66_v26, 2 }
 0x1d8   :  { %v68_v28 = vadd.f32 %v67_v27, %v66_v26 }
 0x1da   :  { %v69_v29 = vrot.slane %v68_v28, 1 }
 0x1dc   :  { %v70_v30 = vadd.f32 %v69_v29, %v68_v28 }
 0x1de   :  { %90 = vpush %v70_v30 }
 0x20f   :  { %s91_s13 = spop %90 }
 0x210   :  { %s72_s14 = smul.f32 0.125, %s91_s13 }
 0x212   :  { %v73_v31 = vstv %s72_s14 }
 0x213   :  { %75 = vst.msk [vmem:[#allocation3] sm:$0x1] %vm74_vm3, %v73_v31 }
 0x214   :  { %111 = shalt.err (!%p108_p4)
}
 0x215   :  { %85 = dma.vmem_to_hbm [thread:$0]  %s83_s1, 16, %s154_s2, [#allocation4]  }
 0x216   :  { %120 = dma.done.wait [#allocation4], 16  }
 0x217   :  { %121 = vsyncadd [#allocation4], 4294967280 }
 0x218   :  { %89 = vsyncpa [#allocation4], 1 }

</bundles_post_ra>
